<compile_context>
chip_gen: v6e
topology: v6e:2x2x1
jax: 0.10.0
libtpu: 0.0.40
codegen_flags: <defaults>
</compile_context>

<pallas_src>
import jax
import jax.numpy as jnp
from jax import lax
from jax.experimental import pallas as pl
from jax.experimental.pallas import tpu as pltpu

_LANE = 128
_SUBLANE = 8
_EPS = 1e-5


def _round_up(n, m):
    return (n + m - 1) // m * m


def _layer_has_bn_act(i, n_linears, final):
    """Final block skips BN/activation on its last linear."""
    return not (final and i == n_linears - 1)


# ----------------------------------------------------------------------------
# Kernels
# ----------------------------------------------------------------------------
def _make_fused_bn_kernel(n_linears, use_bn, final, batch_real, eps=_EPS):
    """Fused Linear -> BN(train) -> ReLU chain; full batch resident in VMEM.

    Ref order: x, then per layer (w[fin,fout] bf16, aux[f32]), then out.
    aux is (3, fout) = [bias; gamma; beta] for BN layers, (1, fout) otherwise.
    """

    def kernel(*refs):
        x_ref = refs[0]
        out_ref = refs[-1]

        bp = x_ref.shape[0]
        # Rows >= batch_real are zero padding; mask them out of BN statistics.
        row_ids = lax.broadcasted_iota(jnp.int32, (bp, 1), 0)
        row_mask = (row_ids < batch_real).astype(jnp.float32)
        inv_n = 1.0 / float(batch_real)

        cur = x_ref[...]  # f32 activations; cast to bf16 only at the dot
        idx = 1
        for i in range(n_linears):
            w_ref = refs[idx]
            aux_ref = refs[idx + 1]
            idx += 2

            # Linear on the MXU: bf16 x bf16 -> f32 accumulation, canonical
            # (B, K) @ (K, N) feed (weights pre-transposed host-side).
            y = jnp.dot(cur.astype(jnp.bfloat16), w_ref[...],
                        preferred_element_type=jnp.float32)
            aux = aux_ref[...].astype(jnp.float32)
            y = y + aux[0:1, :]  # bias

            if _layer_has_bn_act(i, n_linears, final):
                if use_bn:
                    # Single fused pass for sum / sum-of-squares (biased var),
                    # masked to real batch rows.
                    ym = y * row_mask
                    s1 = jnp.sum(ym, axis=0, keepdims=True)
                    s2 = jnp.sum(ym * y, axis=0, keepdims=True)
                    mean = s1 * inv_n
                    var = jnp.maximum(s2 * inv_n - mean * mean, 0.0)
                    gamma = aux[1:2, :]
                    beta = aux[2:3, :]
                    y = (y - mean) * lax.rsqrt(var + eps) * gamma + beta
                y = jnp.maximum(y, 0.0)  # ReLU (f32 epilogue)
            cur = y

        out_ref[...] = cur.astype(out_ref.dtype)

    return kernel


def _make_tiled_kernel(n_linears, final):
    """Linear(+ReLU) chain without BN: rows are independent, batch is tiled."""

    def kernel(*refs):
        x_ref = refs[0]
        out_ref = refs[-1]
        cur = x_ref[...]
        idx = 1
        for i in range(n_linears):
            w_ref = refs[idx]
            aux_ref = refs[idx + 1]
            idx += 2
            y = jnp.dot(cur.astype(jnp.bfloat16), w_ref[...],
                        preferred_element_type=jnp.float32)
            y = y + aux_ref[...].astype(jnp.float32)
            if _layer_has_bn_act(i, n_linears, final):
                y = jnp.maximum(y, 0.0)
            cur = y
        out_ref[...] = cur.astype(out_ref.dtype)

    return kernel


# ----------------------------------------------------------------------------
# Wrappers
# ----------------------------------------------------------------------------
def prepare_block_params(params, *, use_bn: bool, final: bool):
    """One-time preprocessing: pad features to lane (128) multiples, transpose
    weights to (fin, fout) and cast to bf16 for the MXU, pack bias/gamma/beta
    into one aux array."""
    n = len(params)
    fin0 = params[0]["w"].shape[1]
    fout = params[0]["w"].shape[0]
    finp0 = _round_up(fin0, _LANE)
    foutp = _round_up(fout, _LANE)

    prepped = []
    for i, p in enumerate(params):
        w = jnp.asarray(p["w"], jnp.float32)  # (fout, fin) PyTorch layout
        fo, fi = w.shape
        fip = finp0 if i == 0 else foutp
        # Transpose once host-side -> canonical (fin, fout) RHS for the MXU.
        wp = jnp.zeros((fip, foutp), jnp.float32).at[:fi, :fo].set(w.T)
        wp = wp.astype(jnp.bfloat16)  # bf16 weights: full-rate MXU, half DMA

        if use_bn and _layer_has_bn_act(i, n, final):
            aux = jnp.zeros((3, foutp), jnp.float32)
            aux = aux.at[0, :fo].set(jnp.asarray(p["b"], jnp.float32))
            aux = aux.at[1, :fo].set(jnp.asarray(p["gamma"], jnp.float32))
            aux = aux.at[2, :fo].set(jnp.asarray(p["beta"], jnp.float32))
        else:
            aux = jnp.zeros((1, foutp), jnp.float32)
            aux = aux.at[0, :fo].set(jnp.asarray(p["b"], jnp.float32))
        prepped.append((wp, aux))
    return prepped, fin0, fout


def block_forward(x, prepped, fin, fout, *, use_bn: bool, final: bool,
                  batch_tile: int = 128):
    """Runs the fused Block kernel on pre-processed params."""
    n_linears = len(prepped)
    b = x.shape[0]
    finp, foutp = prepped[0][0].shape

    bp = _round_up(b, _SUBLANE)
    xp = jnp.zeros((bp, finp), x.dtype).at[:b, :fin].set(x)

    args = [xp]
    for wp, aux in prepped:
        args.append(wp)
        args.append(aux)

    if use_bn:
        # Training-mode BN needs whole-batch statistics -> full batch in VMEM.
        kernel = _make_fused_bn_kernel(n_linears, use_bn, final, b)

        def full_spec(a):
            nd = a.ndim
            return pl.BlockSpec(a.shape, lambda *_, _n=nd: (0,) * _n)

        out = pl.pallas_call(
            kernel,
            out_shape=jax.ShapeDtypeStruct((bp, foutp), x.dtype),
            in_specs=[full_spec(a) for a in args],
            out_specs=pl.BlockSpec((bp, foutp), lambda *_: (0, 0)),
        )(*args)
    else:
        # No BN: tile the batch; grid marked "parallel" (v7x dual TensorCore).
        tb = bp if bp <= batch_tile else batch_tile
        bp2 = _round_up(bp, tb)
        if bp2 != bp:
            xp = jnp.zeros((bp2, finp), x.dtype).at[:b, :fin].set(x)
            args[0] = xp
            bp = bp2

        kernel = _make_tiled_kernel(n_linears, final)
        in_specs = [pl.BlockSpec((tb, finp), lambda i: (i, 0))]
        for wp, aux in prepped:
            # Weights / aux return the same block index every step -> stay
            # resident in VMEM across the whole grid (no per-step re-DMA).
            in_specs.append(pl.BlockSpec(wp.shape, lambda i: (0, 0)))
            in_specs.append(pl.BlockSpec(aux.shape, lambda i: (0, 0)))

        out = pl.pallas_call(
            kernel,
            out_shape=jax.ShapeDtypeStruct((bp, foutp), x.dtype),
            grid=(bp // tb,),
            in_specs=in_specs,
            out_specs=pl.BlockSpec((tb, foutp), lambda i: (i, 0)),
            compiler_params=pltpu.CompilerParams(
                dimension_semantics=("parallel",)),
        )(*args)

    return out[:b, :fout]


# ----------------------------------------------------------------------------
# Reference + demo
# ----------------------------------------------------------------------------
def _init_params(key, in_features, out_features, n_linears, use_bn):
    """Deterministic, PyTorch-style (uniform fan_in) initialization."""
    params = []
    fin = in_features
    for _ in range(n_linears):
        key, kw, kb = jax.random.split(key, 3)
        bound = 1.0 / jnp.sqrt(fin)
        w = jax.random.uniform(kw, (out_features, fin), jnp.float32, -bound, bound)
        b = jax.random.uniform(kb, (out_features,), jnp.float32, -bound, bound)
        p = {"w": w, "b": b}
        if use_bn:
            p["gamma"] = jnp.ones((out_features,), jnp.float32)
            p["beta"] = jnp.zeros((out_features,), jnp.float32)
        params.append(p)
        fin = out_features
    return params


def _reference(x, params, *, use_bn, final, eps=_EPS):
    """Pure-JAX f32 reference matching PyTorch forward (training-mode BN, ReLU)."""
    n = len(params)
    for i, p in enumerate(params):
        y = x @ p["w"].T + p["b"]
        if final and i == n - 1:
            x = y
        else:
            if use_bn:
                mean = jnp.mean(y, axis=0, keepdims=True)
                var = jnp.mean((y - mean) ** 2, axis=0, keepdims=True)
                y = (y - mean) / jnp.sqrt(var + eps)
                y = y * p["gamma"] + p["beta"]
            x = jnp.maximum(y, 0.0)
    return x


if __name__ == "__main__":
    key = jax.random.PRNGKey(0)
    batch, in_features, out_features, n_linears = 8, 32, 32, 2
    # bf16 MXU inputs with f32 accumulation -> loosen tolerance vs f32 reference.
    ATOL = RTOL = 5e-2

    key, kx, kp1, kp2, kp3, kx2 = jax.random.split(key, 6)
    x = jax.random.normal(kx, (batch, in_features), jnp.float32)

    # 1) Hidden block: Linear -> BatchNorm1d(train) -> ReLU, twice (fused path).
    params_hidden = _init_params(kp1, in_features, out_features, n_linears, use_bn=True)
    prep_h, fin_h, fout_h = prepare_block_params(params_hidden, use_bn=True, final=False)
    out_hidden = block_forward(x, prep_h, fin_h, fout_h, use_bn=True, final=False)
    out_hidden = jax.block_until_ready(out_hidden)
    ref_hidden = _reference(x, params_hidden, use_bn=True, final=False)
    assert jnp.allclose(out_hidden, ref_hidden, atol=ATOL, rtol=RTOL)

    # 2) Final block: last linear has no BN / activation.
    params_final = _init_params(kp2, in_features, out_features, n_linears, use_bn=True)
    prep_f, fin_f, fout_f = prepare_block_params(params_final, use_bn=True, final=True)
    out_final = block_forward(out_hidden, prep_f, fin_f, fout_f, use_bn=True, final=True)
    out_final = jax.block_until_ready(out_final)
    ref_final = _reference(out_hidden, params_final, use_bn=True, final=True)
    assert jnp.allclose(out_final, ref_final, atol=ATOL, rtol=RTOL)

    # 3) No-BN block: exercises the batch-tiled, parallel-grid path.
    big_batch = 256
    x_big = jax.random.normal(kx2, (big_batch, in_features), jnp.float32)
    params_nobn = _init_params(kp3, in_features, out_features, n_linears, use_bn=False)
    prep_n, fin_n, fout_n = prepare_block_params(params_nobn, use_bn=False, final=False)
    out_nobn = block_forward(x_big, prep_n, fin_n, fout_n, use_bn=False, final=False)
    out_nobn = jax.block_until_ready(out_nobn)
    ref_nobn = _reference(x_big, params_nobn, use_bn=False, final=False)
    assert jnp.allclose(out_nobn, ref_nobn, atol=ATOL, rtol=RTOL)

    print("KERNEL_OK")
</pallas_src>

<mosaic_0001>
module attributes {stable_mosaic.version = 11 : i64} {
  func.func @kernel(%arg0: memref<8x128xf32, #tpu.memory_space<vmem>>, %arg1: memref<128x128xbf16, #tpu.memory_space<vmem>>, %arg2: memref<3x128xf32, #tpu.memory_space<vmem>>, %arg3: memref<128x128xbf16, #tpu.memory_space<vmem>>, %arg4: memref<3x128xf32, #tpu.memory_space<vmem>>, %arg5: memref<8x128xf32, #tpu.memory_space<vmem>>) attributes {dimension_semantics = [], scalar_prefetch = 0 : i64, scratch_operands = 0 : i64, tpu.core_type = #tpu.core_type<tc>} {
    %0 = tpu.iota {dimensions = array<i32: 0>} : vector<8x1xi32>
    %c8_i32 = arith.constant 8 : i32
    %1 = vector.broadcast %c8_i32 : i32 to vector<8x1xi32>
    %2 = arith.cmpi slt, %0, %1 : vector<8x1xi32>
    %3 = arith.extui %2 : vector<8x1xi1> to vector<8x1xi32>
    %4 = arith.sitofp %3 : vector<8x1xi32> to vector<8x1xf32>
    %c0 = arith.constant 0 : index
    %c0_0 = arith.constant 0 : index
    %5 = vector.load %arg0[%c0, %c0_0] : memref<8x128xf32, #tpu.memory_space<vmem>>, vector<8x128xf32>
    %6 = arith.truncf %5 : vector<8x128xf32> to vector<8x128xbf16>
    %c0_1 = arith.constant 0 : index
    %c0_2 = arith.constant 0 : index
    %7 = vector.load %arg1[%c0_1, %c0_2] : memref<128x128xbf16, #tpu.memory_space<vmem>>, vector<128x128xbf16>
    %cst = arith.constant dense<0.000000e+00> : vector<8x128xf32>
    %8 = tpu.matmul %6, %7, %cst {dimension_numbers = #tpu.dot_dimension_numbers<[1], [0], [0], [1], [0, 0, 1, 1], [], []>} : vector<8x128xbf16>, vector<128x128xbf16>, vector<8x128xf32> -> vector<8x128xf32>
    %c0_3 = arith.constant 0 : index
    %c0_4 = arith.constant 0 : index
    %9 = vector.load %arg2[%c0_3, %c0_4] : memref<3x128xf32, #tpu.memory_space<vmem>>, vector<3x128xf32>
    %10 = vector.extract_strided_slice %9 {offsets = [0, 0], sizes = [1, 128], strides = [1, 1]} : vector<3x128xf32> to vector<1x128xf32>
    %11 = vector.broadcast %10 : vector<1x128xf32> to vector<8x128xf32>
    %12 = arith.addf %8, %11 : vector<8x128xf32>
    %13 = vector.broadcast %4 : vector<8x1xf32> to vector<8x128xf32>
    %14 = arith.mulf %12, %13 : vector<8x128xf32>
    %cst_5 = arith.constant dense<0.000000e+00> : vector<128xf32>
    %15 = vector.multi_reduction <add>, %14, %cst_5 [0] : vector<8x128xf32> to vector<128xf32>
    %16 = vector.shape_cast %15 : vector<128xf32> to vector<1x128xf32>
    %17 = arith.mulf %14, %12 : vector<8x128xf32>
    %cst_6 = arith.constant dense<0.000000e+00> : vector<128xf32>
    %18 = vector.multi_reduction <add>, %17, %cst_6 [0] : vector<8x128xf32> to vector<128xf32>
    %19 = vector.shape_cast %18 : vector<128xf32> to vector<1x128xf32>
    %cst_7 = arith.constant 1.250000e-01 : f32
    %20 = vector.broadcast %cst_7 : f32 to vector<1x128xf32>
    %21 = arith.mulf %16, %20 : vector<1x128xf32>
    %cst_8 = arith.constant 1.250000e-01 : f32
    %22 = vector.broadcast %cst_8 : f32 to vector<1x128xf32>
    %23 = arith.mulf %19, %22 : vector<1x128xf32>
    %24 = arith.mulf %21, %21 : vector<1x128xf32>
    %25 = arith.subf %23, %24 : vector<1x128xf32>
    %cst_9 = arith.constant 0.000000e+00 : f32
    %26 = vector.broadcast %cst_9 : f32 to vector<1x128xf32>
    %27 = arith.maximumf %25, %26 : vector<1x128xf32>
    %28 = vector.extract_strided_slice %9 {offsets = [1, 0], sizes = [1, 128], strides = [1, 1]} : vector<3x128xf32> to vector<1x128xf32>
    %29 = vector.extract_strided_slice %9 {offsets = [2, 0], sizes = [1, 128], strides = [1, 1]} : vector<3x128xf32> to vector<1x128xf32>
    %30 = vector.broadcast %21 : vector<1x128xf32> to vector<8x128xf32>
    %31 = arith.subf %12, %30 : vector<8x128xf32>
    %cst_10 = arith.constant 9.99999974E-6 : f32
    %32 = vector.broadcast %cst_10 : f32 to vector<1x128xf32>
    %33 = arith.addf %27, %32 : vector<1x128xf32>
    %34 = math.rsqrt %33 : vector<1x128xf32>
    %35 = vector.broadcast %34 : vector<1x128xf32> to vector<8x128xf32>
    %36 = arith.mulf %31, %35 : vector<8x128xf32>
    %37 = vector.broadcast %28 : vector<1x128xf32> to vector<8x128xf32>
    %38 = arith.mulf %36, %37 : vector<8x128xf32>
    %39 = vector.broadcast %29 : vector<1x128xf32> to vector<8x128xf32>
    %40 = arith.addf %38, %39 : vector<8x128xf32>
    %cst_11 = arith.constant 0.000000e+00 : f32
    %41 = vector.broadcast %cst_11 : f32 to vector<8x128xf32>
    %42 = arith.maximumf %40, %41 : vector<8x128xf32>
    %43 = arith.truncf %42 : vector<8x128xf32> to vector<8x128xbf16>
    %c0_12 = arith.constant 0 : index
    %c0_13 = arith.constant 0 : index
    %44 = vector.load %arg3[%c0_12, %c0_13] : memref<128x128xbf16, #tpu.memory_space<vmem>>, vector<128x128xbf16>
    %cst_14 = arith.constant dense<0.000000e+00> : vector<8x128xf32>
    %45 = tpu.matmul %43, %44, %cst_14 {dimension_numbers = #tpu.dot_dimension_numbers<[1], [0], [0], [1], [0, 0, 1, 1], [], []>} : vector<8x128xbf16>, vector<128x128xbf16>, vector<8x128xf32> -> vector<8x128xf32>
    %c0_15 = arith.constant 0 : index
    %c0_16 = arith.constant 0 : index
    %46 = vector.load %arg4[%c0_15, %c0_16] : memref<3x128xf32, #tpu.memory_space<vmem>>, vector<3x128xf32>
    %47 = vector.extract_strided_slice %46 {offsets = [0, 0], sizes = [1, 128], strides = [1, 1]} : vector<3x128xf32> to vector<1x128xf32>
    %48 = vector.broadcast %47 : vector<1x128xf32> to vector<8x128xf32>
    %49 = arith.addf %45, %48 : vector<8x128xf32>
    %50 = vector.broadcast %4 : vector<8x1xf32> to vector<8x128xf32>
    %51 = arith.mulf %49, %50 : vector<8x128xf32>
    %cst_17 = arith.constant dense<0.000000e+00> : vector<128xf32>
    %52 = vector.multi_reduction <add>, %51, %cst_17 [0] : vector<8x128xf32> to vector<128xf32>
    %53 = vector.shape_cast %52 : vector<128xf32> to vector<1x128xf32>
    %54 = arith.mulf %51, %49 : vector<8x128xf32>
    %cst_18 = arith.constant dense<0.000000e+00> : vector<128xf32>
    %55 = vector.multi_reduction <add>, %54, %cst_18 [0] : vector<8x128xf32> to vector<128xf32>
    %56 = vector.shape_cast %55 : vector<128xf32> to vector<1x128xf32>
    %cst_19 = arith.constant 1.250000e-01 : f32
    %57 = vector.broadcast %cst_19 : f32 to vector<1x128xf32>
    %58 = arith.mulf %53, %57 : vector<1x128xf32>
    %cst_20 = arith.constant 1.250000e-01 : f32
    %59 = vector.broadcast %cst_20 : f32 to vector<1x128xf32>
    %60 = arith.mulf %56, %59 : vector<1x128xf32>
    %61 = arith.mulf %58, %58 : vector<1x128xf32>
    %62 = arith.subf %60, %61 : vector<1x128xf32>
    %cst_21 = arith.constant 0.000000e+00 : f32
    %63 = vector.broadcast %cst_21 : f32 to vector<1x128xf32>
    %64 = arith.maximumf %62, %63 : vector<1x128xf32>
    %65 = vector.extract_strided_slice %46 {offsets = [1, 0], sizes = [1, 128], strides = [1, 1]} : vector<3x128xf32> to vector<1x128xf32>
    %66 = vector.extract_strided_slice %46 {offsets = [2, 0], sizes = [1, 128], strides = [1, 1]} : vector<3x128xf32> to vector<1x128xf32>
    %67 = vector.broadcast %58 : vector<1x128xf32> to vector<8x128xf32>
    %68 = arith.subf %49, %67 : vector<8x128xf32>
    %cst_22 = arith.constant 9.99999974E-6 : f32
    %69 = vector.broadcast %cst_22 : f32 to vector<1x128xf32>
    %70 = arith.addf %64, %69 : vector<1x128xf32>
    %71 = math.rsqrt %70 : vector<1x128xf32>
    %72 = vector.broadcast %71 : vector<1x128xf32> to vector<8x128xf32>
    %73 = arith.mulf %68, %72 : vector<8x128xf32>
    %74 = vector.broadcast %65 : vector<1x128xf32> to vector<8x128xf32>
    %75 = arith.mulf %73, %74 : vector<8x128xf32>
    %76 = vector.broadcast %66 : vector<1x128xf32> to vector<8x128xf32>
    %77 = arith.addf %75, %76 : vector<8x128xf32>
    %cst_23 = arith.constant 0.000000e+00 : f32
    %78 = vector.broadcast %cst_23 : f32 to vector<8x128xf32>
    %79 = arith.maximumf %77, %78 : vector<8x128xf32>
    %c0_24 = arith.constant 0 : index
    %c0_25 = arith.constant 0 : index
    %80 = vector.load %arg5[%c0_24, %c0_25] : memref<8x128xf32, #tpu.memory_space<vmem>>, vector<8x128xf32>
    tpu.vector_store %arg5[%c0_24, %c0_25], %79 {strides = array<i32>} : memref<8x128xf32, #tpu.memory_space<vmem>>, vector<8x128xf32>,
    return
  }
}

</mosaic_0001>

<bundles_post_ra>
// kernel: tpu_custom_call.1
= control target key start
LH: loop header
LB: loop body
LE: loop exit
PB: predicated region body
PF: predicated region fallthrough
CT: control target
= control target key end

     0   :  { %10 = vsyncpa [#allocation3], 0  ;;  %s664_s0 = inlined_call_operand.hbm [shape: f32[8,128], index: 0, kind: input, shape index: {}]   ;;  %s665_s1 = inlined_call_operand.hbm [shape: bf16[128,128], index: 1, kind: input, shape index: {}]   ;;  %s666_s2 = inlined_call_operand.hbm [shape: f32[3,128], index: 2, kind: input, shape index: {}]   ;;  %s667_s3 = inlined_call_operand.hbm [shape: bf16[128,128], index: 3, kind: input, shape index: {}]   ;;  %s668_s4 = inlined_call_operand.vmem [shape: f32[3,128], index: 4, kind: input, shape index: {}]   ;;  %s669_s5 = inlined_call_operand.hbm [shape: f32[8,128], index: 5, kind: output, shape index: {}]  }
   0x1   :  { %11 = vsyncpa [#allocation6], 0 }
   0x2   :  { %12 = vsyncpa [#allocation9], 0 }
   0x3   :  { %13 = vsyncpa [#allocation4], 0  ;;  %s596_s18 = smov [#allocation5]  }
   0x4   :  { %s29_s19 = sshll.u32 %s596_s18, 4  ;;  %s30_s19 = int_to_ptr.vmem [resolvable:$true] %s29_s19 }
   0x5   :  { %s496_s20 = scalar_lea.vmem %s30_s19, 1024  ;;  %p501_p1 = scmp.lt.s32.totalorder %s30_s19, %s30_s19 }
   0x6   :  { %p497_p0 = scmp.ne.s32.totalorder %s30_s19, %s496_s20  ;;  %p502_p2 = scmp.lt.s32.totalorder %s496_s20, %s496_s20 }
   0x8   :  { %p503_p3 = por %p502_p2, %p501_p1 }
   0xa   :  { %p504_p4 = pnand %p503_p3, %p497_p0 }
   0xc   :  { %507 = shalt.err (!%p504_p4)
}
   0xd   :  { %s597_s21 = smov 64   ;;  %s598_s22 = smov 4  }
   0xe   :  { %35 = dma.hbm_to_vmem [thread:$0]  %s665_s1, 1024, %s30_s19, [#allocation6], %s597_s21, %s597_s21, %s598_s22  }
   0xf   :  { %s599_s25 = smov [#allocation2]   ;;  %s600_s27 = smov [#allocation7]  }
  0x10   :  { %s20_s26 = sshll.u32 %s599_s25, 4  ;;  %s42_s28 = sshll.u32 %s600_s27, 4  ;;  %s21_s26 = int_to_ptr.vmem [resolvable:$true] %s20_s26  ;;  %s43_s28 = int_to_ptr.vmem [resolvable:$true] %s42_s28 }
  0x11   :  { %s516_s29 = scalar_lea.vmem %s21_s26, 128  ;;  %p521_p6 = scmp.lt.s32.totalorder %s21_s26, %s21_s26 }
  0x12   :  { %p517_p5 = scmp.ne.s32.totalorder %s21_s26, %s516_s29  ;;  %p522_p7 = scmp.lt.s32.totalorder %s516_s29, %s516_s29 }
  0x14   :  { %p523_p8 = por %p522_p7, %p521_p6 }
  0x16   :  { %p524_p9 = pnand %p523_p8, %p517_p5 }
  0x18   :  { %527 = shalt.err (!%p524_p9)
}
  0x19   :  { %23 = dma.hbm_to_vmem [thread:$0]  %s664_s0, 128, %s21_s26, [#allocation3]  }
  0x1a   :  { %s536_s7 = scalar_lea.vmem %s43_s28, 64  ;;  %p541_p11 = scmp.lt.s32.totalorder %s43_s28, %s43_s28 }
  0x1b   :  { %p537_p10 = scmp.ne.s32.totalorder %s43_s28, %s536_s7  ;;  %p542_p12 = scmp.lt.s32.totalorder %s536_s7, %s536_s7 }
  0x1d   :  { %p543_p13 = por %p542_p12, %p541_p11 }
  0x1f   :  { %p544_p0 = pnand %p543_p13, %p537_p10 }
  0x21   :  { %547 = shalt.err (!%p544_p0)
}
  0x22   :  { %45 = dma.hbm_to_vmem [thread:$0]  %s666_s2, 64, %s43_s28, [#allocation6]  }
  0x23   :  { %s601_s9 = smov [#allocation8]  }
  0x24   :  { %s51_s10 = sshll.u32 %s601_s9, 4  ;;  %s52_s10 = int_to_ptr.vmem [resolvable:$true] %s51_s10 }
  0x25   :  { %s556_s11 = scalar_lea.vmem %s52_s10, 1024  ;;  %p561_p2 = scmp.lt.s32.totalorder %s52_s10, %s52_s10 }
  0x26   :  { %p557_p1 = scmp.ne.s32.totalorder %s52_s10, %s556_s11  ;;  %p562_p3 = scmp.lt.s32.totalorder %s556_s11, %s556_s11 }
  0x28   :  { %p563_p4 = por %p562_p3, %p561_p2 }
  0x2a   :  { %p564_p5 = pnand %p563_p4, %p557_p1 }
  0x2c   :  { %567 = shalt.err (!%p564_p5)
}
  0x2d   :  { %57 = dma.hbm_to_vmem [thread:$0]  %s667_s3, 1024, %s52_s10, [#allocation9], %s597_s21, %s597_s21, %s598_s22  }
  0x2e   :  { %588 = dma.done.wait [#allocation3], 128  }
  0x2f   :  { %589 = vsyncadd [#allocation3], 4294967168 }
  0x30   :  { %590 = dma.done.wait [#allocation6], 1088  }
  0x31   :  { %591 = vsyncadd [#allocation6], 4294966208 }
  0x32   :  { %592 = dma.done.wait [#allocation9], 1024  }
  0x33   :  { %593 = vsyncadd [#allocation9], 4294966272  ;;  %v602_v0 = vmov 0.0   ;;  %vm603_vm0 = vmmov 0   ;;  %v468_v1 = vld [vmem:[#allocation5 + $0x38] sm:$0xff]   ;;  %v469_v2 = vld [vmem:[#allocation5 + $0x30] sm:$0xff]   ;;  %v97_v19 = vlaneseq }
  0x34   :  { %419 = vmatprep.subr.bf16.mxu0 %v602_v0  ;;  %435 = vmatprep.mubr.msk.bf16.mxu0 %vm603_vm0, %v602_v0  ;;  %v470_v3 = vld [vmem:[#allocation5 + $0x28] sm:$0xff]   ;;  %v471_v4 = vld [vmem:[#allocation5 + $0x20] sm:$0xff]   ;;  %v472_v5 = vld [vmem:[#allocation5 + $0x18] sm:$0xff]  }
  0x35   :  { %439 = vmatprep.subr.bf16.mxu1 %v602_v0  ;;  %455 = vmatprep.mubr.msk.bf16.mxu1 %vm603_vm0, %v602_v0  ;;  %v473_v6 = vld [vmem:[#allocation5 + $0x10] sm:$0xff]   ;;  %v474_v7 = vld [vmem:[#allocation5 + $0x8] sm:$0xff]   ;;  %v475_v8 = vld [vmem:[#allocation5] sm:$0xff]   ;;  %v653_v20 = vshrl.u32 %v97_v19, 7 }
  0x36   :  { %420 = vmatpush3.bf16.msra.mxu0 %v468_v1  ;;  %v78_v9 = vld [vmem:[#allocation2] sm:$0xff]  ;;  %v478_v13 = vld [vmem:[#allocation8 + $0x28] sm:$0xff]   ;;  %v479_v14 = vld [vmem:[#allocation8 + $0x20] sm:$0xff]  }
  0x37   :  { %421 = vmatprep.subr.bf16.mxu0 %v602_v0  ;;  %v79_v10 = vpack.c.bf16 %v78_v9, %v78_v9  ;;  %v476_v11 = vld [vmem:[#allocation8 + $0x38] sm:$0xff]   ;;  %v477_v12 = vld [vmem:[#allocation8 + $0x30] sm:$0xff]   ;;  %v482_v17 = vld [vmem:[#allocation8 + $0x8] sm:$0xff]   ;;  %v99_v21 = vsub.s32 0, %v653_v20  ;;  %v214_v48 = vsub.s32 1, %v653_v20  ;;  %v219_v49 = vsub.s32 2, %v653_v20 }
  0x38   :  { %440 = vmatpush3.bf16.msra.mxu1 %v476_v11  ;;  %v480_v15 = vld [vmem:[#allocation8 + $0x18] sm:$0xff]   ;;  %v481_v16 = vld [vmem:[#allocation8 + $0x10] sm:$0xff]   ;;  %v483_v18 = vld [vmem:[#allocation8] sm:$0xff]  }
  0x39   :  { %441 = vmatprep.subr.bf16.mxu1 %v602_v0  ;;  %v96_v22 = vld [vmem:[#allocation7] sm:$0x7]  ;;  %v240_v59 = vld [vmem:[%s668_s4] sm:$0x7]  ;;  %s604_s4 = smov [#allocation10]  }
  0x3a   :  { %422 = vmatpush3.bf16.msra.mxu0 %v469_v2  ;;  %v100_v23 = vrot.slane %v96_v22, %v99_v21  ;;  %v215_v51 = vrot.slane %v96_v22, %v214_v48  ;;  %v220_v54 = vrot.slane %v96_v22, %v219_v49  ;;  %v244_v60 = vrot.slane %v240_v59, %v99_v21  ;;  %s374_s13 = sshll.u32 %s604_s4, 4  ;;  %s375_s13 = int_to_ptr.vmem [resolvable:$true] %s374_s13 }
  0x3b   :  { %423 = vmatprep.subr.bf16.mxu0 %v602_v0  ;;  %v359_v22 = vrot.slane %v240_v59, %v214_v48  ;;  %s568_s14 = scalar_lea.vmem %s375_s13, 128  ;;  %p573_p7 = scmp.lt.s32.totalorder %s375_s13, %s375_s13 }
  0x3c   :  { %442 = vmatpush3.bf16.msra.mxu1 %v477_v12  ;;  %p569_p6 = scmp.ne.s32.totalorder %s375_s13, %s568_s14  ;;  %p574_p8 = scmp.lt.s32.totalorder %s568_s14, %s568_s14 }
  0x3d   :  { %443 = vmatprep.subr.bf16.mxu1 %v602_v0 }
  0x3e   :  { %424 = vmatpush3.bf16.msra.mxu0 %v470_v3  ;;  %p575_p9 = por %p574_p8, %p573_p7 }
  0x3f   :  { %425 = vmatprep.subr.bf16.mxu0 %v602_v0 }
  0x40   :  { %444 = vmatpush3.bf16.msra.mxu1 %v478_v13  ;;  %p576_p10 = pnand %p575_p9, %p569_p6 }
  0x41   :  { %445 = vmatprep.subr.bf16.mxu1 %v602_v0 }
  0x42   :  { %426 = vmatpush3.bf16.msra.mxu0 %v471_v4 }
  0x43   :  { %427 = vmatprep.subr.bf16.mxu0 %v602_v0 }
  0x44   :  { %446 = vmatpush3.bf16.msra.mxu1 %v479_v14 }
  0x45   :  { %447 = vmatprep.subr.bf16.mxu1 %v602_v0 }
  0x46   :  { %428 = vmatpush3.bf16.msra.mxu0 %v472_v5 }
  0x47   :  { %429 = vmatprep.subr.bf16.mxu0 %v602_v0 }
  0x48   :  { %448 = vmatpush3.bf16.msra.mxu1 %v480_v15 }
  0x49   :  { %449 = vmatprep.subr.bf16.mxu1 %v602_v0 }
  0x4a   :  { %430 = vmatpush3.bf16.msra.mxu0 %v473_v6 }
  0x4b   :  { %431 = vmatprep.subr.bf16.mxu0 %v602_v0 }
  0x4c   :  { %450 = vmatpush3.bf16.msra.mxu1 %v481_v16 }
  0x4d   :  { %451 = vmatprep.subr.bf16.mxu1 %v602_v0 }
  0x4e   :  { %432 = vmatpush3.bf16.msra.mxu0 %v474_v7 }
  0x4f   :  { %433 = vmatprep.subr.bf16.mxu0 %v602_v0 }
  0x50   :  { %452 = vmatpush3.bf16.msra.mxu1 %v482_v17 }
  0x51   :  { %453 = vmatprep.subr.bf16.mxu1 %v602_v0 }
  0x52   :  { %434 = vmatpush3.bf16.msra.mxu0 %v475_v8 }
  0x54   :  { %454 = vmatpush3.bf16.msra.mxu1 %v483_v18 }
  0x55   :  { %436 = vmatmul.mubr.bf16.vlgmr.msra.gmra.mxu0 %v79_v10 }
 0x115   :  { %v183_v24 = vpop.f32.mrf.mxu0 }
 0x116   :  { %v184_v25 = vadd.f32 %v183_v24, %v100_v23 }
 0x117   :  { %v437_v26 = vpop.f32.mrf.mxu0 }
 0x118   :  { %v190_v27 = vrot.slane %v184_v25, 4  ;;  %v196_v28 = vmul.f32 %v184_v25, %v184_v25 }
 0x119   :  { %v186_v29 = vpop.f32.mrf.mxu0 }
 0x11a   :  { %v191_v30 = vadd.f32 %v190_v27, %v184_v25  ;;  %v197_v31 = vrot.slane %v196_v28, 4 }
 0x11b   :  { %v438_v32 = vpop.f32.mrf.mxu0 }
 0x11c   :  { %v192_v33 = vrot.slane %v191_v30, 2  ;;  %v198_v34 = vadd.f32 %v197_v31, %v196_v28 }
 0x11e   :  { %v193_v35 = vadd.f32 %v192_v33, %v191_v30  ;;  %v199_v36 = vrot.slane %v198_v34, 2 }
 0x120   :  { %v194_v37 = vrot.slane %v193_v35, 1  ;;  %v200_v38 = vadd.f32 %v199_v36, %v198_v34 }
 0x122   :  { %v195_v39 = vadd.f32 %v194_v37, %v193_v35  ;;  %v201_v40 = vrot.slane %v200_v38, 1 }
 0x124   :  { %v202_v41 = vadd.f32 %v201_v40, %v200_v38  ;;  %v203_v42 = vmul.f32 0.125, %v195_v39 }
 0x126   :  { %v204_v43 = vmul.f32 0.125, %v202_v41  ;;  %v205_v44 = vmul.f32 %v203_v42, %v203_v42  ;;  %v208_v50 = vsub.f32 %v184_v25, %v203_v42  ;;  %v364_v25 = vrot.slane %v240_v59, %v219_v49 }
 0x128   :  { %v206_v45 = vsub.f32 %v204_v43, %v205_v44 }
 0x12a   :  { %v207_v46 = vmax.f32 %v206_v45, 0.0 }
 0x12c   :  { %v209_v47 = vadd.f32 1e-05, %v207_v46 }
 0x12e   :  { %484 = vrsqrt.f32 %v209_v47 }
 0x13b   :  { %v485_v52 = vpop.eup %484 }
 0x13c   :  { %v211_v53 = vmul.f32 %v485_v52, %v208_v50 }
 0x13e   :  { %v216_v55 = vmul.f32 %v215_v51, %v211_v53 }
 0x140   :  { %v221_v56 = vadd.f32 %v220_v54, %v216_v55 }
 0x142   :  { %v222_v57 = vmax.f32 %v221_v56, 0.0 }
 0x144   :  { %v223_v58 = vpack.c.bf16 %v222_v57, %v222_v57 }
 0x146   :  { %456 = vmatmul.mubr.bf16.vlgmr.msra.gmra.mxu1 %v223_v58 }
 0x206   :  { %v327_v61 = vpop.f32.mrf.mxu1 }
 0x207   :  { %v328_v62 = vadd.f32 %v327_v61, %v244_v60 }
 0x208   :  { %v457_v63 = vpop.f32.mrf.mxu1 }
 0x209   :  { %v334_v0 = vrot.slane %v328_v62, 4  ;;  %v340_v1 = vmul.f32 %v328_v62, %v328_v62 }
 0x20a   :  { %v330_v2 = vpop.f32.mrf.mxu1 }
 0x20b   :  { %v335_v3 = vadd.f32 %v334_v0, %v328_v62  ;;  %v341_v4 = vrot.slane %v340_v1, 4 }
 0x20c   :  { %v458_v5 = vpop.f32.mrf.mxu1 }
 0x20d   :  { %v336_v6 = vrot.slane %v335_v3, 2  ;;  %v342_v7 = vadd.f32 %v341_v4, %v340_v1 }
 0x20f   :  { %v337_v8 = vadd.f32 %v336_v6, %v335_v3  ;;  %v343_v9 = vrot.slane %v342_v7, 2 }
 0x211   :  { %v338_v10 = vrot.slane %v337_v8, 1  ;;  %v344_v11 = vadd.f32 %v343_v9, %v342_v7 }
 0x213   :  { %v339_v12 = vadd.f32 %v338_v10, %v337_v8  ;;  %v345_v13 = vrot.slane %v344_v11, 1 }
 0x215   :  { %v346_v14 = vadd.f32 %v345_v13, %v344_v11  ;;  %v347_v15 = vmul.f32 0.125, %v339_v12 }
 0x217   :  { %v348_v16 = vmul.f32 0.125, %v346_v14  ;;  %v349_v17 = vmul.f32 %v347_v15, %v347_v15  ;;  %v352_v21 = vsub.f32 %v328_v62, %v347_v15 }
 0x219   :  { %v350_v18 = vsub.f32 %v348_v16, %v349_v17 }
 0x21b   :  { %v351_v19 = vmax.f32 %v350_v18, 0.0 }
 0x21d   :  { %v353_v20 = vadd.f32 1e-05, %v351_v19 }
 0x21f   :  { %486 = vrsqrt.f32 %v353_v20 }
 0x22c   :  { %v487_v23 = vpop.eup %486 }
 0x22d   :  { %v355_v24 = vmul.f32 %v487_v23, %v352_v21 }
 0x22f   :  { %v360_v26 = vmul.f32 %v359_v22, %v355_v24 }
 0x231   :  { %v365_v27 = vadd.f32 %v364_v25, %v360_v26 }
 0x233   :  { %v366_v28 = vmax.f32 %v365_v27, 0.0 }
 0x235   :  { %367 = vst [vmem:[#allocation10] sm:$0xff] %v366_v28 }
 0x236   :  { %579 = shalt.err (!%p576_p10)
}
 0x237   :  { %377 = dma.vmem_to_hbm [thread:$0]  %s375_s13, 128, %s669_s5, [#allocation4]  }
 0x238   :  { %594 = dma.done.wait [#allocation4], 128  }
 0x239   :  { %595 = vsyncadd [#allocation4], 4294967168 }
 0x23a   :  { %381 = vsyncpa [#allocation3], 1 }
 0x23b   :  { %382 = vsyncpa [#allocation6], 1 }
 0x23c   :  { %383 = vsyncpa [#allocation9], 1 }
 0x23d   :  { %384 = vsyncpa [#allocation4], 1 }

</bundles_post_ra>
